<compile_context>
chip_gen: v7x
topology: tpu7x:2x2x1
jax: 0.10.0
libtpu: 0.0.40
codegen_flags: <defaults>
</compile_context>

<pallas_src>
import functools

import jax
import jax.numpy as jnp
from jax.experimental import pallas as pl
from jax.experimental.pallas import tpu as pltpu

_SELU_ALPHA = 1.6732632423543772848170429916717
_SELU_SCALE = 1.0507009873554804934193349852946

_LANE = 128        # last dim padded to a multiple of this (lane-dense)
_BF16_ROWS = 16    # bf16 packs 16 rows per sublane group
_NEG_INF = -1e30


def _round_up(n, m):
    return ((n + m - 1) // m) * m


def _cdiv(a, b):
    return -(-a // b)


def _selu(y):
    # exp only on the non-positive branch to avoid overflow on the unselected lane
    return _SELU_SCALE * jnp.where(
        y > 0.0, y, _SELU_ALPHA * (jnp.exp(jnp.minimum(y, 0.0)) - 1.0)
    )


def _mlp_kernel(*refs, n_layers):
    """refs = (x_ref, w0, b0, w1, b1, ..., o_ref). All padded to 128 lanes.

    x is bf16, weights bf16, biases f32 (last bias carries -1e30 on padded
    lanes so the softmax needs no explicit mask). Chains every layer in
    VMEM/vregs with f32 MXU accumulation and f32 elementwise math.
    """
    x_ref, o_ref = refs[0], refs[-1]

    y = x_ref[...]                                   # (TILE_B, in_pad) bf16
    for i in range(n_layers):
        w_ref = refs[1 + 2 * i]                      # (in_pad, out_pad) bf16, resident
        b_ref = refs[2 + 2 * i]                      # (1, out_pad) f32, resident
        y_in = y if y.dtype == jnp.bfloat16 else y.astype(jnp.bfloat16)
        y = jnp.dot(y_in, w_ref[...], preferred_element_type=jnp.float32)
        y = y + b_ref[...]
        if i < n_layers - 1:
            y = _selu(y)

    # Softmax; padded lanes already sit at -1e30 via the last bias -> exp == 0.
    m = jnp.max(y, axis=-1, keepdims=True)
    e = jnp.exp(y - m)
    s = jnp.sum(e, axis=-1, keepdims=True)
    # Exact reciprocal (still EUP): rows must sum to 1 within f32 rounding.
    o_ref[...] = (e * pl.reciprocal(s, approx=False)).astype(o_ref.dtype)


def _choose_tile_b(B):
    """Batch tile: multiple of 16 (bf16 packing), >=2 grid steps when B allows
    (v7x megacore), capped at 512, padding bounded by one 16-row group."""
    max_tile = 512
    if B <= _BF16_ROWS:
        return _BF16_ROWS
    n_tiles_target = max(2, _cdiv(B, max_tile))
    return min(max_tile, _round_up(_cdiv(B, n_tiles_target), _BF16_ROWS))


def mlp_forward(x, params):
    """x: (B, in) f32.  params: list of (w_t (in,out) f32, b (1,out) f32)."""
    B, in_dim = x.shape
    n_layers = len(params)
    dims = [in_dim] + [w.shape[1] for w, _ in params]
    dims_pad = [_round_up(d, _LANE) for d in dims]
    out_real, out_pad = dims[-1], dims_pad[-1]

    tile_b = _choose_tile_b(B)
    b_pad = _round_up(B, tile_b)
    n_tiles = b_pad // tile_b

    # Zero-pad input / parameters to lane-dense shapes (once, in JAX).
    # Input streams in bf16: halves HBM DMA bytes and drops one in-kernel cast.
    x_p = (
        jnp.zeros((b_pad, dims_pad[0]), jnp.float32)
        .at[:B, :in_dim].set(x)
        .astype(jnp.bfloat16)
    )
    flat_params = []
    for i, (w, b) in enumerate(params):
        w_p = (
            jnp.zeros((dims_pad[i], dims_pad[i + 1]), jnp.float32)
            .at[: dims[i], : dims[i + 1]].set(w)
            .astype(jnp.bfloat16)
        )
        is_last = i == n_layers - 1
        # Last layer: padded bias lanes get -1e30 (padded weight columns are
        # zero, so the bias alone masks the softmax padding for free).
        fill = _NEG_INF if (is_last and dims[i + 1] < dims_pad[i + 1]) else 0.0
        b_p = (
            jnp.full((1, dims_pad[i + 1]), fill, jnp.float32)
            .at[:, : dims[i + 1]].set(b)
        )
        flat_params += [w_p, b_p]

    # Explicit VMEM budget: single-buffered resident weights + per-layer
    # activation intermediates (f32 + bf16 copy) + double-buffered I/O tiles.
    weight_bytes = sum(int(p.size) * p.dtype.itemsize for p in flat_params)
    act_bytes = tile_b * sum(dims_pad) * (4 + 2)
    io_bytes = 2 * tile_b * dims_pad[0] * 2 + 2 * tile_b * out_pad * 4
    vmem_bytes = int(1.25 * (weight_bytes + act_bytes + io_bytes))
    vmem_bytes = min(max(vmem_bytes, 16 << 20), 100 << 20)
    # TODO(synk): if weight_bytes alone exceeds the per-core VMEM budget
    # (~40 MiB on v7x), fall back to tiling the widest layer's output-feature
    # dimension over a second grid axis instead of keeping all weights resident.

    kernel = functools.partial(_mlp_kernel, n_layers=n_layers)
    out_shape = jax.ShapeDtypeStruct((b_pad, out_pad), jnp.float32)
    out_spec = pl.BlockSpec((tile_b, out_pad), lambda i: (i, 0))
    cparams = pltpu.CompilerParams(
        dimension_semantics=("parallel",),
        vmem_limit_bytes=vmem_bytes,
    )

    def _call(single_buffer_weights):
        in_specs = [pl.BlockSpec((tile_b, dims_pad[0]), lambda i: (i, 0))]
        for p in flat_params:
            if single_buffer_weights:
                # Constant block -> single buffer (default double-buffering of
                # resident weights is pure VMEM waste).
                spec = pl.BlockSpec(
                    p.shape, lambda i: (0, 0), pipeline_mode=pl.Buffered(1)
                )
            else:
                spec = pl.BlockSpec(p.shape, lambda i: (0, 0))
            in_specs.append(spec)
        return pl.pallas_call(
            kernel,
            out_shape=out_shape,
            grid=(n_tiles,),
            in_specs=in_specs,
            out_specs=out_spec,
            compiler_params=cparams,
        )(x_p, *flat_params)

    try:
        out_p = _call(True)
    except Exception:
        # Fallback for JAX builds / interpret modes without Buffered(1) support.
        out_p = _call(False)

    return out_p[:B, :out_real]


def init_mlp_params(key, sizes):
    """Xavier-uniform weights, nn.Linear-style uniform biases. Deterministic."""
    params = []
    for i in range(len(sizes) - 1):
        fan_in, fan_out = sizes[i], sizes[i + 1]
        key, wk, bk = jax.random.split(key, 3)
        limit = (6.0 / (fan_in + fan_out)) ** 0.5  # xavier_uniform_
        # Stored transposed: (in, out) so the kernel computes x @ w_t.
        w_t = jax.random.uniform(
            wk, (fan_in, fan_out), jnp.float32, minval=-limit, maxval=limit
        )
        b_limit = 1.0 / (fan_in ** 0.5)  # nn.Linear default bias init
        b = jax.random.uniform(
            bk, (1, fan_out), jnp.float32, minval=-b_limit, maxval=b_limit
        )
        params.append((w_t, b))
    return params


def mlp_reference(x, params):
    """Plain-JAX reference with the same precision strategy (bf16 matmul
    operands, f32 accumulation / elementwise) for a tight sanity check."""
    n = len(params)
    y = x
    for i, (w, b) in enumerate(params):
        y = jnp.dot(
            y.astype(jnp.bfloat16), w.astype(jnp.bfloat16),
            preferred_element_type=jnp.float32,
        ) + b
        if i < n - 1:
            y = _selu(y)
    return jax.nn.softmax(y, axis=-1)


if __name__ == "__main__":
    key = jax.random.PRNGKey(0)
    sizes = [32, 64, 48, 16]  # MLP(sizes) -> 3 linear layers
    batch = 8

    pkey, xkey = jax.random.split(key)
    params = init_mlp_params(pkey, sizes)
    x = jax.random.normal(xkey, (batch, sizes[0]), jnp.float32)

    out = mlp_forward(x, params)
    out = jax.block_until_ready(out)

    ref = mlp_reference(x, params)
    assert out.shape == (batch, sizes[-1]), out.shape
    assert jnp.allclose(out, ref, atol=1e-2, rtol=1e-2), "mismatch vs reference"
    assert jnp.allclose(jnp.sum(out, axis=-1), 1.0, atol=1e-3)

    print("KERNEL_OK")
</pallas_src>

<mosaic_0001>
module attributes {stable_mosaic.version = 11 : i64} {
  func.func @_mlp_kernel(%arg0: i32, %arg1: memref<16x128xbf16, #tpu.memory_space<vmem>>, %arg2: memref<128x128xbf16, #tpu.memory_space<vmem>>, %arg3: memref<1x128xf32, #tpu.memory_space<vmem>>, %arg4: memref<128x128xbf16, #tpu.memory_space<vmem>>, %arg5: memref<1x128xf32, #tpu.memory_space<vmem>>, %arg6: memref<128x128xbf16, #tpu.memory_space<vmem>>, %arg7: memref<1x128xf32, #tpu.memory_space<vmem>>, %arg8: memref<16x128xf32, #tpu.memory_space<vmem>>) attributes {dimension_semantics = [#tpu.dimension_semantics<parallel>], iteration_bounds = array<i64: 1>, scalar_prefetch = 0 : i64, scratch_operands = 0 : i64, tpu.core_type = #tpu.core_type<tc>, window_params = [{transform_indices = @transform_0, window_bounds = array<i64: 16, 128>}, {pipeline_mode = #tpu.pipeline_mode<synchronous>, transform_indices = @transform_1, window_bounds = array<i64: 128, 128>}, {pipeline_mode = #tpu.pipeline_mode<synchronous>, transform_indices = @transform_2, window_bounds = array<i64: 1, 128>}, {pipeline_mode = #tpu.pipeline_mode<synchronous>, transform_indices = @transform_3, window_bounds = array<i64: 128, 128>}, {pipeline_mode = #tpu.pipeline_mode<synchronous>, transform_indices = @transform_4, window_bounds = array<i64: 1, 128>}, {pipeline_mode = #tpu.pipeline_mode<synchronous>, transform_indices = @transform_5, window_bounds = array<i64: 128, 128>}, {pipeline_mode = #tpu.pipeline_mode<synchronous>, transform_indices = @transform_6, window_bounds = array<i64: 1, 128>}, {transform_indices = @transform_7, window_bounds = array<i64: 16, 128>}]} {
    %c0 = arith.constant 0 : index
    %c0_0 = arith.constant 0 : index
    %0 = vector.load %arg1[%c0, %c0_0] : memref<16x128xbf16, #tpu.memory_space<vmem>>, vector<16x128xbf16>
    %c0_1 = arith.constant 0 : index
    %c0_2 = arith.constant 0 : index
    %1 = vector.load %arg2[%c0_1, %c0_2] : memref<128x128xbf16, #tpu.memory_space<vmem>>, vector<128x128xbf16>
    %cst = arith.constant dense<0.000000e+00> : vector<16x128xf32>
    %2 = tpu.matmul %0, %1, %cst {dimension_numbers = #tpu.dot_dimension_numbers<[1], [0], [0], [1], [0, 0, 1, 1], [], []>} : vector<16x128xbf16>, vector<128x128xbf16>, vector<16x128xf32> -> vector<16x128xf32>
    %c0_3 = arith.constant 0 : index
    %c0_4 = arith.constant 0 : index
    %3 = vector.load %arg3[%c0_3, %c0_4] : memref<1x128xf32, #tpu.memory_space<vmem>>, vector<1x128xf32>
    %4 = vector.broadcast %3 : vector<1x128xf32> to vector<16x128xf32>
    %5 = arith.addf %2, %4 : vector<16x128xf32>
    %cst_5 = arith.constant 0.000000e+00 : f32
    %6 = vector.broadcast %cst_5 : f32 to vector<16x128xf32>
    %7 = arith.cmpf ogt, %5, %6 : vector<16x128xf32>
    %cst_6 = arith.constant 0.000000e+00 : f32
    %8 = vector.broadcast %cst_6 : f32 to vector<16x128xf32>
    %9 = arith.minimumf %5, %8 : vector<16x128xf32>
    %10 = math.exp %9 : vector<16x128xf32>
    %cst_7 = arith.constant 1.000000e+00 : f32
    %11 = vector.broadcast %cst_7 : f32 to vector<16x128xf32>
    %12 = arith.subf %10, %11 : vector<16x128xf32>
    %cst_8 = arith.constant 1.67326319 : f32
    %13 = vector.broadcast %cst_8 : f32 to vector<16x128xf32>
    %14 = arith.mulf %13, %12 : vector<16x128xf32>
    %15 = arith.select %7, %5, %14 : vector<16x128xi1>, vector<16x128xf32>
    %cst_9 = arith.constant 1.05070102 : f32
    %16 = vector.broadcast %cst_9 : f32 to vector<16x128xf32>
    %17 = arith.mulf %16, %15 : vector<16x128xf32>
    %18 = arith.truncf %17 : vector<16x128xf32> to vector<16x128xbf16>
    %c0_10 = arith.constant 0 : index
    %c0_11 = arith.constant 0 : index
    %19 = vector.load %arg4[%c0_10, %c0_11] : memref<128x128xbf16, #tpu.memory_space<vmem>>, vector<128x128xbf16>
    %cst_12 = arith.constant dense<0.000000e+00> : vector<16x128xf32>
    %20 = tpu.matmul %18, %19, %cst_12 {dimension_numbers = #tpu.dot_dimension_numbers<[1], [0], [0], [1], [0, 0, 1, 1], [], []>} : vector<16x128xbf16>, vector<128x128xbf16>, vector<16x128xf32> -> vector<16x128xf32>
    %c0_13 = arith.constant 0 : index
    %c0_14 = arith.constant 0 : index
    %21 = vector.load %arg5[%c0_13, %c0_14] : memref<1x128xf32, #tpu.memory_space<vmem>>, vector<1x128xf32>
    %22 = vector.broadcast %21 : vector<1x128xf32> to vector<16x128xf32>
    %23 = arith.addf %20, %22 : vector<16x128xf32>
    %cst_15 = arith.constant 0.000000e+00 : f32
    %24 = vector.broadcast %cst_15 : f32 to vector<16x128xf32>
    %25 = arith.cmpf ogt, %23, %24 : vector<16x128xf32>
    %cst_16 = arith.constant 0.000000e+00 : f32
    %26 = vector.broadcast %cst_16 : f32 to vector<16x128xf32>
    %27 = arith.minimumf %23, %26 : vector<16x128xf32>
    %28 = math.exp %27 : vector<16x128xf32>
    %cst_17 = arith.constant 1.000000e+00 : f32
    %29 = vector.broadcast %cst_17 : f32 to vector<16x128xf32>
    %30 = arith.subf %28, %29 : vector<16x128xf32>
    %cst_18 = arith.constant 1.67326319 : f32
    %31 = vector.broadcast %cst_18 : f32 to vector<16x128xf32>
    %32 = arith.mulf %31, %30 : vector<16x128xf32>
    %33 = arith.select %25, %23, %32 : vector<16x128xi1>, vector<16x128xf32>
    %cst_19 = arith.constant 1.05070102 : f32
    %34 = vector.broadcast %cst_19 : f32 to vector<16x128xf32>
    %35 = arith.mulf %34, %33 : vector<16x128xf32>
    %36 = arith.truncf %35 : vector<16x128xf32> to vector<16x128xbf16>
    %c0_20 = arith.constant 0 : index
    %c0_21 = arith.constant 0 : index
    %37 = vector.load %arg6[%c0_20, %c0_21] : memref<128x128xbf16, #tpu.memory_space<vmem>>, vector<128x128xbf16>
    %cst_22 = arith.constant dense<0.000000e+00> : vector<16x128xf32>
    %38 = tpu.matmul %36, %37, %cst_22 {dimension_numbers = #tpu.dot_dimension_numbers<[1], [0], [0], [1], [0, 0, 1, 1], [], []>} : vector<16x128xbf16>, vector<128x128xbf16>, vector<16x128xf32> -> vector<16x128xf32>
    %c0_23 = arith.constant 0 : index
    %c0_24 = arith.constant 0 : index
    %39 = vector.load %arg7[%c0_23, %c0_24] : memref<1x128xf32, #tpu.memory_space<vmem>>, vector<1x128xf32>
    %40 = vector.broadcast %39 : vector<1x128xf32> to vector<16x128xf32>
    %41 = arith.addf %38, %40 : vector<16x128xf32>
    %cst_25 = arith.constant dense<0xFF800000> : vector<16xf32>
    %42 = vector.multi_reduction <maximumf>, %41, %cst_25 [1] : vector<16x128xf32> to vector<16xf32>
    %43 = vector.shape_cast %42 : vector<16xf32> to vector<16x1xf32>
    %44 = vector.broadcast %43 : vector<16x1xf32> to vector<16x128xf32>
    %45 = arith.subf %41, %44 : vector<16x128xf32>
    %46 = math.exp %45 : vector<16x128xf32>
    %cst_26 = arith.constant dense<0.000000e+00> : vector<16xf32>
    %47 = vector.multi_reduction <add>, %46, %cst_26 [1] : vector<16x128xf32> to vector<16xf32>
    %48 = vector.shape_cast %47 : vector<16xf32> to vector<16x1xf32>
    %49 = tpu.reciprocal %48 : vector<16x1xf32> -> vector<16x1xf32>
    %50 = vector.broadcast %49 : vector<16x1xf32> to vector<16x128xf32>
    %51 = arith.mulf %46, %50 : vector<16x128xf32>
    %c0_27 = arith.constant 0 : index
    %c0_28 = arith.constant 0 : index
    %52 = vector.load %arg8[%c0_27, %c0_28] : memref<16x128xf32, #tpu.memory_space<vmem>>, vector<16x128xf32>
    tpu.vector_store %arg8[%c0_27, %c0_28], %51 {strides = array<i32>} : memref<16x128xf32, #tpu.memory_space<vmem>>, vector<16x128xf32>,
    return
  }
  func.func @transform_0(%arg0: i32) -> (i32, i32) {
    %c0_i32 = arith.constant 0 : i32
    %c0_i32_0 = arith.constant 0 : i32
    return %arg0, %c0_i32 : i32, i32
  }
  func.func @transform_1(%arg0: i32) -> (i32, i32) {
    %c0_i32 = arith.constant 0 : i32
    %c0_i32_0 = arith.constant 0 : i32
    %c0_i32_1 = arith.constant 0 : i32
    return %c0_i32, %c0_i32_0 : i32, i32
  }
  func.func @transform_2(%arg0: i32) -> (i32, i32) {
    %c0_i32 = arith.constant 0 : i32
    %c0_i32_0 = arith.constant 0 : i32
    %c0_i32_1 = arith.constant 0 : i32
    return %c0_i32, %c0_i32_0 : i32, i32
  }
  func.func @transform_3(%arg0: i32) -> (i32, i32) {
    %c0_i32 = arith.constant 0 : i32
    %c0_i32_0 = arith.constant 0 : i32
    %c0_i32_1 = arith.constant 0 : i32
    return %c0_i32, %c0_i32_0 : i32, i32
  }
  func.func @transform_4(%arg0: i32) -> (i32, i32) {
    %c0_i32 = arith.constant 0 : i32
    %c0_i32_0 = arith.constant 0 : i32
    %c0_i32_1 = arith.constant 0 : i32
    return %c0_i32, %c0_i32_0 : i32, i32
  }
  func.func @transform_5(%arg0: i32) -> (i32, i32) {
    %c0_i32 = arith.constant 0 : i32
    %c0_i32_0 = arith.constant 0 : i32
    %c0_i32_1 = arith.constant 0 : i32
    return %c0_i32, %c0_i32_0 : i32, i32
  }
  func.func @transform_6(%arg0: i32) -> (i32, i32) {
    %c0_i32 = arith.constant 0 : i32
    %c0_i32_0 = arith.constant 0 : i32
    %c0_i32_1 = arith.constant 0 : i32
    return %c0_i32, %c0_i32_0 : i32, i32
  }
  func.func @transform_7(%arg0: i32) -> (i32, i32) {
    %c0_i32 = arith.constant 0 : i32
    %c0_i32_0 = arith.constant 0 : i32
    return %arg0, %c0_i32 : i32, i32
  }
}

module attributes {stable_mosaic.version = 11 : i64} {
  func.func @_mlp_kernel(%arg0: i32, %arg1: memref<16x128xbf16, #tpu.memory_space<vmem>>, %arg2: memref<128x128xbf16, #tpu.memory_space<vmem>>, %arg3: memref<1x128xf32, #tpu.memory_space<vmem>>, %arg4: memref<128x128xbf16, #tpu.memory_space<vmem>>, %arg5: memref<1x128xf32, #tpu.memory_space<vmem>>, %arg6: memref<128x128xbf16, #tpu.memory_space<vmem>>, %arg7: memref<1x128xf32, #tpu.memory_space<vmem>>, %arg8: memref<16x128xf32, #tpu.memory_space<vmem>>) attributes {dimension_semantics = [#tpu.dimension_semantics<parallel>], iteration_bounds = array<i64: 1>, scalar_prefetch = 0 : i64, scratch_operands = 0 : i64, tpu.core_type = #tpu.core_type<tc>, window_params = [{transform_indices = @transform_0, window_bounds = array<i64: 16, 128>}, {pipeline_mode = #tpu.pipeline_mode<synchronous>, transform_indices = @transform_1, window_bounds = array<i64: 128, 128>}, {pipeline_mode = #tpu.pipeline_mode<synchronous>, transform_indices = @transform_2, window_bounds = array<i64: 1, 128>}, {pipeline_mode = #tpu.pipeline_mode<synchronous>, transform_indices = @transform_3, window_bounds = array<i64: 128, 128>}, {pipeline_mode = #tpu.pipeline_mode<synchronous>, transform_indices = @transform_4, window_bounds = array<i64: 1, 128>}, {pipeline_mode = #tpu.pipeline_mode<synchronous>, transform_indices = @transform_5, window_bounds = array<i64: 128, 128>}, {pipeline_mode = #tpu.pipeline_mode<synchronous>, transform_indices = @transform_6, window_bounds = array<i64: 1, 128>}, {transform_indices = @transform_7, window_bounds = array<i64: 16, 128>}]} {
    %c0 = arith.constant 0 : index
    %c0_0 = arith.constant 0 : index
    %0 = vector.load %arg1[%c0, %c0_0] : memref<16x128xbf16, #tpu.memory_space<vmem>>, vector<16x128xbf16>
    %c0_1 = arith.constant 0 : index
    %c0_2 = arith.constant 0 : index
    %1 = vector.load %arg2[%c0_1, %c0_2] : memref<128x128xbf16, #tpu.memory_space<vmem>>, vector<128x128xbf16>
    %cst = arith.constant dense<0.000000e+00> : vector<16x128xf32>
    %2 = tpu.matmul %0, %1, %cst {dimension_numbers = #tpu.dot_dimension_numbers<[1], [0], [0], [1], [0, 0, 1, 1], [], []>} : vector<16x128xbf16>, vector<128x128xbf16>, vector<16x128xf32> -> vector<16x128xf32>
    %c0_3 = arith.constant 0 : index
    %c0_4 = arith.constant 0 : index
    %3 = vector.load %arg3[%c0_3, %c0_4] : memref<1x128xf32, #tpu.memory_space<vmem>>, vector<1x128xf32>
    %4 = vector.broadcast %3 : vector<1x128xf32> to vector<16x128xf32>
    %5 = arith.addf %2, %4 : vector<16x128xf32>
    %cst_5 = arith.constant 0.000000e+00 : f32
    %6 = vector.broadcast %cst_5 : f32 to vector<16x128xf32>
    %7 = arith.cmpf ogt, %5, %6 : vector<16x128xf32>
    %cst_6 = arith.constant 0.000000e+00 : f32
    %8 = vector.broadcast %cst_6 : f32 to vector<16x128xf32>
    %9 = arith.minimumf %5, %8 : vector<16x128xf32>
    %10 = math.exp %9 : vector<16x128xf32>
    %cst_7 = arith.constant 1.000000e+00 : f32
    %11 = vector.broadcast %cst_7 : f32 to vector<16x128xf32>
    %12 = arith.subf %10, %11 : vector<16x128xf32>
    %cst_8 = arith.constant 1.67326319 : f32
    %13 = vector.broadcast %cst_8 : f32 to vector<16x128xf32>
    %14 = arith.mulf %13, %12 : vector<16x128xf32>
    %15 = arith.select %7, %5, %14 : vector<16x128xi1>, vector<16x128xf32>
    %cst_9 = arith.constant 1.05070102 : f32
    %16 = vector.broadcast %cst_9 : f32 to vector<16x128xf32>
    %17 = arith.mulf %16, %15 : vector<16x128xf32>
    %18 = arith.truncf %17 : vector<16x128xf32> to vector<16x128xbf16>
    %c0_10 = arith.constant 0 : index
    %c0_11 = arith.constant 0 : index
    %19 = vector.load %arg4[%c0_10, %c0_11] : memref<128x128xbf16, #tpu.memory_space<vmem>>, vector<128x128xbf16>
    %cst_12 = arith.constant dense<0.000000e+00> : vector<16x128xf32>
    %20 = tpu.matmul %18, %19, %cst_12 {dimension_numbers = #tpu.dot_dimension_numbers<[1], [0], [0], [1], [0, 0, 1, 1], [], []>} : vector<16x128xbf16>, vector<128x128xbf16>, vector<16x128xf32> -> vector<16x128xf32>
    %c0_13 = arith.constant 0 : index
    %c0_14 = arith.constant 0 : index
    %21 = vector.load %arg5[%c0_13, %c0_14] : memref<1x128xf32, #tpu.memory_space<vmem>>, vector<1x128xf32>
    %22 = vector.broadcast %21 : vector<1x128xf32> to vector<16x128xf32>
    %23 = arith.addf %20, %22 : vector<16x128xf32>
    %cst_15 = arith.constant 0.000000e+00 : f32
    %24 = vector.broadcast %cst_15 : f32 to vector<16x128xf32>
    %25 = arith.cmpf ogt, %23, %24 : vector<16x128xf32>
    %cst_16 = arith.constant 0.000000e+00 : f32
    %26 = vector.broadcast %cst_16 : f32 to vector<16x128xf32>
    %27 = arith.minimumf %23, %26 : vector<16x128xf32>
    %28 = math.exp %27 : vector<16x128xf32>
    %cst_17 = arith.constant 1.000000e+00 : f32
    %29 = vector.broadcast %cst_17 : f32 to vector<16x128xf32>
    %30 = arith.subf %28, %29 : vector<16x128xf32>
    %cst_18 = arith.constant 1.67326319 : f32
    %31 = vector.broadcast %cst_18 : f32 to vector<16x128xf32>
    %32 = arith.mulf %31, %30 : vector<16x128xf32>
    %33 = arith.select %25, %23, %32 : vector<16x128xi1>, vector<16x128xf32>
    %cst_19 = arith.constant 1.05070102 : f32
    %34 = vector.broadcast %cst_19 : f32 to vector<16x128xf32>
    %35 = arith.mulf %34, %33 : vector<16x128xf32>
    %36 = arith.truncf %35 : vector<16x128xf32> to vector<16x128xbf16>
    %c0_20 = arith.constant 0 : index
    %c0_21 = arith.constant 0 : index
    %37 = vector.load %arg6[%c0_20, %c0_21] : memref<128x128xbf16, #tpu.memory_space<vmem>>, vector<128x128xbf16>
    %cst_22 = arith.constant dense<0.000000e+00> : vector<16x128xf32>
    %38 = tpu.matmul %36, %37, %cst_22 {dimension_numbers = #tpu.dot_dimension_numbers<[1], [0], [0], [1], [0, 0, 1, 1], [], []>} : vector<16x128xbf16>, vector<128x128xbf16>, vector<16x128xf32> -> vector<16x128xf32>
    %c0_23 = arith.constant 0 : index
    %c0_24 = arith.constant 0 : index
    %39 = vector.load %arg7[%c0_23, %c0_24] : memref<1x128xf32, #tpu.memory_space<vmem>>, vector<1x128xf32>
    %40 = vector.broadcast %39 : vector<1x128xf32> to vector<16x128xf32>
    %41 = arith.addf %38, %40 : vector<16x128xf32>
    %cst_25 = arith.constant dense<0xFF800000> : vector<16xf32>
    %42 = vector.multi_reduction <maximumf>, %41, %cst_25 [1] : vector<16x128xf32> to vector<16xf32>
    %43 = vector.shape_cast %42 : vector<16xf32> to vector<16x1xf32>
    %44 = vector.broadcast %43 : vector<16x1xf32> to vector<16x128xf32>
    %45 = arith.subf %41, %44 : vector<16x128xf32>
    %46 = math.exp %45 : vector<16x128xf32>
    %cst_26 = arith.constant dense<0.000000e+00> : vector<16xf32>
    %47 = vector.multi_reduction <add>, %46, %cst_26 [1] : vector<16x128xf32> to vector<16xf32>
    %48 = vector.shape_cast %47 : vector<16xf32> to vector<16x1xf32>
    %49 = tpu.reciprocal %48 : vector<16x1xf32> -> vector<16x1xf32>
    %50 = vector.broadcast %49 : vector<16x1xf32> to vector<16x128xf32>
    %51 = arith.mulf %46, %50 : vector<16x128xf32>
    %c0_27 = arith.constant 0 : index
    %c0_28 = arith.constant 0 : index
    %52 = vector.load %arg8[%c0_27, %c0_28] : memref<16x128xf32, #tpu.memory_space<vmem>>, vector<16x128xf32>
    tpu.vector_store %arg8[%c0_27, %c0_28], %51 {strides = array<i32>} : memref<16x128xf32, #tpu.memory_space<vmem>>, vector<16x128xf32>,
    return
  }
  func.func @transform_0(%arg0: i32) -> (i32, i32) {
    %c0_i32 = arith.constant 0 : i32
    %c0_i32_0 = arith.constant 0 : i32
    return %arg0, %c0_i32 : i32, i32
  }
  func.func @transform_1(%arg0: i32) -> (i32, i32) {
    %c0_i32 = arith.constant 0 : i32
    %c0_i32_0 = arith.constant 0 : i32
    %c0_i32_1 = arith.constant 0 : i32
    return %c0_i32, %c0_i32_0 : i32, i32
  }
  func.func @transform_2(%arg0: i32) -> (i32, i32) {
    %c0_i32 = arith.constant 0 : i32
    %c0_i32_0 = arith.constant 0 : i32
    %c0_i32_1 = arith.constant 0 : i32
    return %c0_i32, %c0_i32_0 : i32, i32
  }
  func.func @transform_3(%arg0: i32) -> (i32, i32) {
    %c0_i32 = arith.constant 0 : i32
    %c0_i32_0 = arith.constant 0 : i32
    %c0_i32_1 = arith.constant 0 : i32
    return %c0_i32, %c0_i32_0 : i32, i32
  }
  func.func @transform_4(%arg0: i32) -> (i32, i32) {
    %c0_i32 = arith.constant 0 : i32
    %c0_i32_0 = arith.constant 0 : i32
    %c0_i32_1 = arith.constant 0 : i32
    return %c0_i32, %c0_i32_0 : i32, i32
  }
  func.func @transform_5(%arg0: i32) -> (i32, i32) {
    %c0_i32 = arith.constant 0 : i32
    %c0_i32_0 = arith.constant 0 : i32
    %c0_i32_1 = arith.constant 0 : i32
    return %c0_i32, %c0_i32_0 : i32, i32
  }
  func.func @transform_6(%arg0: i32) -> (i32, i32) {
    %c0_i32 = arith.constant 0 : i32
    %c0_i32_0 = arith.constant 0 : i32
    %c0_i32_1 = arith.constant 0 : i32
    return %c0_i32, %c0_i32_0 : i32, i32
  }
  func.func @transform_7(%arg0: i32) -> (i32, i32) {
    %c0_i32 = arith.constant 0 : i32
    %c0_i32_0 = arith.constant 0 : i32
    return %arg0, %c0_i32 : i32, i32
  }
}

</mosaic_0001>

<bundles_post_ra>
// kernel: tpu_custom_call.1
= control target key start
LH: loop header
LB: loop body
LE: loop exit
PB: predicated region body
PF: predicated region fallthrough
CT: control target
= control target key end

     0   :  { %12 = vsyncpa [#allocation3], 0  ;;  %s965_s0 = inlined_call_operand.hbm [shape: bf16[16,128], index: 0, kind: input, shape index: {}]   ;;  %s966_s1 = inlined_call_operand.hbm [shape: bf16[128,128], index: 1, kind: input, shape index: {}]   ;;  %s967_s2 = inlined_call_operand.vmem [shape: f32[1,128], index: 2, kind: input, shape index: {}]   ;;  %s968_s3 = inlined_call_operand.hbm [shape: bf16[128,128], index: 3, kind: input, shape index: {}]   ;;  %s969_s4 = inlined_call_operand.vmem [shape: f32[1,128], index: 4, kind: input, shape index: {}]   ;;  %s970_s5 = inlined_call_operand.hbm [shape: bf16[128,128], index: 5, kind: input, shape index: {}]   ;;  %s971_s6 = inlined_call_operand.vmem [shape: f32[1,128], index: 6, kind: input, shape index: {}]   ;;  %s972_s7 = inlined_call_operand.hbm [shape: f32[16,128], index: 7, kind: output, shape index: {}]  }
   0x1   :  { %13 = vsyncpa [#allocation6], 0 }
   0x2   :  { %14 = vsyncpa [#allocation9], 0 }
   0x3   :  { %15 = vsyncpa [#allocation4], 0  ;;  %s789_s24 = smov [#allocation5]   ;;  %s790_s26 = smov [#allocation2]  }
   0x4   :  { %s33_s25 = sshll.u32 %s789_s24, 4  ;;  %s21_s27 = sshll.u32 %s790_s26, 4  ;;  %s34_s25 = int_to_ptr.vmem [resolvable:$true] %s33_s25  ;;  %s840_s27 = int_to_ptr.vmem [resolvable:$true] %s21_s27 }
   0x5   :  { %s671_s30 = scalar_lea.hbm %s966_s1, 1024 }
   0x6   :  { %p672_p0 = scmp.ne.s32.totalorder %s966_s1, %s671_s30  ;;  %p675_p1 = scmp.lt.u32.totalorder %s671_s30, %s966_s1 }
   0x8   :  { %p677_p2 = pnand %p675_p1, %p672_p0 }
   0xa   :  { %680 = shalt.err (!%p677_p2)
}
   0xb   :  { %s681_s12 = scalar_lea.vmem %s34_s25, 1024  ;;  %p686_p4 = scmp.lt.s32.totalorder %s34_s25, %s34_s25 }
   0xc   :  { %p682_p3 = scmp.ne.s32.totalorder %s34_s25, %s681_s12  ;;  %p687_p5 = scmp.lt.s32.totalorder %s681_s12, %s681_s12 }
   0xe   :  { %p688_p6 = por %p687_p5, %p686_p4 }
  0x10   :  { %p689_p7 = pnand %p688_p6, %p682_p3 }
  0x12   :  { %692 = shalt.err (!%p689_p7)
}
  0x13   :  { %s791_s13 = smov 64   ;;  %s792_s14 = smov 4  }
  0x14   :  { %39 = dma.hbm_to_vmem [thread:$0]  %s966_s1, 1024, %s34_s25, [#allocation6], %s791_s13, %s791_s13, %s792_s14  }
  0x15   :  { %s693_s19 = scalar_lea.hbm %s965_s0, 128 }
  0x16   :  { %p694_p8 = scmp.ne.s32.totalorder %s965_s0, %s693_s19  ;;  %p697_p9 = scmp.lt.u32.totalorder %s693_s19, %s965_s0 }
  0x18   :  { %p699_p10 = pnand %p697_p9, %p694_p8 }
  0x1a   :  { %702 = shalt.err (!%p699_p10)
}
  0x1b   :  { %s703_s24 = scalar_lea.vmem %s840_s27, 128  ;;  %p708_p12 = scmp.lt.s32.totalorder %s840_s27, %s840_s27 }
  0x1c   :  { %p704_p11 = scmp.ne.s32.totalorder %s840_s27, %s703_s24  ;;  %p709_p13 = scmp.lt.s32.totalorder %s703_s24, %s703_s24 }
  0x1e   :  { %p710_p0 = por %p709_p13, %p708_p12 }
  0x20   :  { %p711_p1 = pnand %p710_p0, %p704_p11 }
  0x22   :  { %714 = shalt.err (!%p711_p1)
}
  0x23   :  { %27 = dma.hbm_to_vmem [thread:$0]  %s965_s0, 128, %s840_s27, [#allocation3], %s791_s13, %s791_s13, %s792_s14  }
  0x24   :  { %s793_s26 = smov [#allocation7]   ;;  %s794_s29 = smov [#allocation8]  }
  0x25   :  { %s47_s28 = sshll.u32 %s793_s26, 4  ;;  %s61_s30 = sshll.u32 %s794_s29, 4  ;;  %s48_s28 = int_to_ptr.vmem [resolvable:$true] %s47_s28  ;;  %s877_s30 = int_to_ptr.vmem [resolvable:$true] %s61_s30 }
  0x26   :  { %s715_s10 = scalar_lea.hbm %s968_s3, 1024 }
  0x27   :  { %p716_p2 = scmp.ne.s32.totalorder %s968_s3, %s715_s10  ;;  %p719_p3 = scmp.lt.u32.totalorder %s715_s10, %s968_s3 }
  0x29   :  { %p721_p4 = pnand %p719_p3, %p716_p2 }
  0x2b   :  { %724 = shalt.err (!%p721_p4)
}
  0x2c   :  { %s725_s0 = scalar_lea.vmem %s48_s28, 1024  ;;  %p730_p6 = scmp.lt.s32.totalorder %s48_s28, %s48_s28 }
  0x2d   :  { %p726_p5 = scmp.ne.s32.totalorder %s48_s28, %s725_s0  ;;  %p731_p7 = scmp.lt.s32.totalorder %s725_s0, %s725_s0 }
  0x2f   :  { %p732_p8 = por %p731_p7, %p730_p6 }
  0x31   :  { %p733_p9 = pnand %p732_p8, %p726_p5 }
  0x33   :  { %736 = shalt.err (!%p733_p9)
}
  0x34   :  { %53 = dma.hbm_to_vmem [thread:$0]  %s968_s3, 1024, %s48_s28, [#allocation6], %s791_s13, %s791_s13, %s792_s14  }
  0x35   :  { %s737_s20 = scalar_lea.hbm %s970_s5, 1024 }
  0x36   :  { %p738_p10 = scmp.ne.s32.totalorder %s970_s5, %s737_s20  ;;  %p741_p11 = scmp.lt.u32.totalorder %s737_s20, %s970_s5 }
  0x38   :  { %p743_p12 = pnand %p741_p11, %p738_p10 }
  0x3a   :  { %746 = shalt.err (!%p743_p12)
}
  0x3b   :  { %s747_s1 = scalar_lea.vmem %s877_s30, 1024  ;;  %p752_p0 = scmp.lt.s32.totalorder %s877_s30, %s877_s30 }
  0x3c   :  { %p748_p13 = scmp.ne.s32.totalorder %s877_s30, %s747_s1  ;;  %p753_p1 = scmp.lt.s32.totalorder %s747_s1, %s747_s1 }
  0x3e   :  { %p754_p2 = por %p753_p1, %p752_p0 }
  0x40   :  { %p755_p3 = pnand %p754_p2, %p748_p13 }
  0x42   :  { %758 = shalt.err (!%p755_p3)
}
  0x43   :  { %67 = dma.hbm_to_vmem [thread:$0]  %s970_s5, 1024, %s877_s30, [#allocation9], %s791_s13, %s791_s13, %s792_s14  }
  0x44   :  { %781 = dma.done.wait [#allocation3], 128  }
  0x45   :  { %782 = vsyncadd [#allocation3], 4294967168 }
  0x46   :  { %783 = dma.done.wait [#allocation6], 2048  }
  0x47   :  { %784 = vsyncadd [#allocation6], 4294965248 }
  0x48   :  { %785 = dma.done.wait [#allocation9], 1024  }
  0x49   :  { %786 = vsyncadd [#allocation9], 4294966272  ;;  %v795_v0 = vmov 0.0   ;;  %vm796_vm0 = vmmov 0   ;;  %v630_v1 = vld [vmem:[#allocation5] sm:$0xff]   ;;  %v631_v2 = vld [vmem:[#allocation5 + $0x8] sm:$0xff]  }
  0x4a   :  { %559 = vmatprep.subr.bf16.mxu0 %v795_v0  ;;  %575 = vmatprep.mubr.msk.bf16.mxu0 %vm796_vm0, %v795_v0  ;;  %v632_v3 = vld [vmem:[#allocation5 + $0x10] sm:$0xff]   ;;  %v639_v4 = vld [vmem:[#allocation7] sm:$0xff]   ;;  %v633_v5 = vld [vmem:[#allocation5 + $0x18] sm:$0xff]  }
  0x4b   :  { %579 = vmatprep.subr.bf16.mxu1 %v795_v0  ;;  %595 = vmatprep.mubr.msk.bf16.mxu1 %vm796_vm0, %v795_v0  ;;  %v634_v6 = vld [vmem:[#allocation5 + $0x20] sm:$0xff]   ;;  %v635_v7 = vld [vmem:[#allocation5 + $0x28] sm:$0xff]   ;;  %v636_v8 = vld [vmem:[#allocation5 + $0x30] sm:$0xff]  }
  0x4c   :  { %560 = vmatpush3.bf16.msra.mxu0 %v630_v1  ;;  %580 = vmatpush3.bf16.msra.mxu1 %v639_v4  ;;  %v637_v9 = vld [vmem:[#allocation5 + $0x38] sm:$0xff]   ;;  %v640_v11 = vld [vmem:[#allocation7 + $0x8] sm:$0xff]   ;;  %v641_v12 = vld [vmem:[#allocation7 + $0x10] sm:$0xff]  }
  0x4d   :  { %561 = vmatprep.subr.bf16.mxu0 %v795_v0  ;;  %581 = vmatprep.subr.bf16.mxu1 %v795_v0  ;;  %v638_v10 = vld [vmem:[#allocation2] sm:$0xff]   ;;  %v643_v14 = vld [vmem:[#allocation7 + $0x20] sm:$0xff]   ;;  %v644_v15 = vld [vmem:[#allocation7 + $0x28] sm:$0xff]  }
  0x4e   :  { %v642_v13 = vld [vmem:[#allocation7 + $0x18] sm:$0xff]   ;;  %v645_v16 = vld [vmem:[#allocation7 + $0x30] sm:$0xff]   ;;  %v647_v18 = vld [vmem:[#allocation8] sm:$0xff]  }
  0x4f   :  { %v646_v17 = vld [vmem:[#allocation7 + $0x38] sm:$0xff]   ;;  %v648_v41 = vld [vmem:[#allocation8 + $0x8] sm:$0xff]   ;;  %v649_v42 = vld [vmem:[#allocation8 + $0x10] sm:$0xff]  }
  0x50   :  { %562 = vmatpush3.bf16.msra.mxu0 %v631_v2  ;;  %582 = vmatpush3.bf16.msra.mxu1 %v640_v11  ;;  %v500_v19 = vld [vmem:[%s967_s2] ss:$0 sm:$0xff]  ;;  %v651_v44 = vld [vmem:[#allocation8 + $0x20] sm:$0xff]   ;;  %v652_v45 = vld [vmem:[#allocation8 + $0x28] sm:$0xff]  }
  0x51   :  { %563 = vmatprep.subr.bf16.mxu0 %v795_v0  ;;  %583 = vmatprep.subr.bf16.mxu1 %v795_v0  ;;  %v650_v43 = vld [vmem:[#allocation8 + $0x18] sm:$0xff]   ;;  %v653_v46 = vld [vmem:[#allocation8 + $0x30] sm:$0xff]  }
  0x52   :  { %v654_v47 = vld [vmem:[#allocation8 + $0x38] sm:$0xff]  }
  0x53   :  { %v512_v48 = vld [vmem:[%s969_s4] ss:$0 sm:$0xff] }
  0x54   :  { %564 = vmatpush3.bf16.msra.mxu0 %v632_v3  ;;  %584 = vmatpush3.bf16.msra.mxu1 %v641_v12 }
  0x55   :  { %565 = vmatprep.subr.bf16.mxu0 %v795_v0  ;;  %585 = vmatprep.subr.bf16.mxu1 %v795_v0 }
  0x58   :  { %566 = vmatpush3.bf16.msra.mxu0 %v633_v5  ;;  %586 = vmatpush3.bf16.msra.mxu1 %v642_v13 }
  0x59   :  { %567 = vmatprep.subr.bf16.mxu0 %v795_v0  ;;  %587 = vmatprep.subr.bf16.mxu1 %v795_v0 }
  0x5c   :  { %568 = vmatpush3.bf16.msra.mxu0 %v634_v6  ;;  %588 = vmatpush3.bf16.msra.mxu1 %v643_v14  ;;  %v523_v6 = vld [vmem:[%s971_s6] ss:$0 sm:$0xff]  ;;  %s797_s6 = smov [#allocation10]  }
  0x5d   :  { %569 = vmatprep.subr.bf16.mxu0 %v795_v0  ;;  %589 = vmatprep.subr.bf16.mxu1 %v795_v0  ;;  %s486_s28 = sshll.u32 %s797_s6, 4  ;;  %s487_s28 = int_to_ptr.vmem [resolvable:$true] %s486_s28 }
  0x5e   :  { %s759_s29 = scalar_lea.vmem %s487_s28, 256  ;;  %p764_p5 = scmp.lt.s32.totalorder %s487_s28, %s487_s28 }
  0x5f   :  { %p760_p4 = scmp.ne.s32.totalorder %s487_s28, %s759_s29  ;;  %p765_p6 = scmp.lt.s32.totalorder %s759_s29, %s759_s29 }
  0x60   :  { %570 = vmatpush3.bf16.msra.mxu0 %v635_v7  ;;  %590 = vmatpush3.bf16.msra.mxu1 %v644_v15 }
  0x61   :  { %571 = vmatprep.subr.bf16.mxu0 %v795_v0  ;;  %591 = vmatprep.subr.bf16.mxu1 %v795_v0  ;;  %p766_p7 = por %p765_p6, %p764_p5 }
  0x63   :  { %p767_p8 = pnand %p766_p7, %p760_p4 }
  0x64   :  { %572 = vmatpush3.bf16.msra.mxu0 %v636_v8  ;;  %592 = vmatpush3.bf16.msra.mxu1 %v645_v16 }
  0x65   :  { %573 = vmatprep.subr.bf16.mxu0 %v795_v0  ;;  %593 = vmatprep.subr.bf16.mxu1 %v795_v0 }
  0x68   :  { %574 = vmatpush3.bf16.msra.mxu0 %v637_v9  ;;  %594 = vmatpush3.bf16.msra.mxu1 %v646_v17 }
  0x69   :  { %599 = vmatprep.subr.bf16.mxu0 %v795_v0 }
  0x6b   :  { %576 = vmatmul.mubr.bf16.vlgmr.msra.gmra.mrb[0].mxu0 %v638_v10 }
  0x6c   :  { %615 = vmatprep.mubr.msk.bf16.mxu0 %vm796_vm0, %v795_v0  ;;  %600 = vmatpush3.bf16.msra.mxu0 %v647_v18 }
  0x6d   :  { %601 = vmatprep.subr.bf16.mxu0 %v795_v0 }
  0x70   :  { %602 = vmatpush3.bf16.msra.mxu0 %v648_v41 }
  0x71   :  { %603 = vmatprep.subr.bf16.mxu0 %v795_v0 }
  0x74   :  { %604 = vmatpush3.bf16.msra.mxu0 %v649_v42 }
  0x75   :  { %605 = vmatprep.subr.bf16.mxu0 %v795_v0 }
  0x78   :  { %606 = vmatpush3.bf16.msra.mxu0 %v650_v43 }
  0x79   :  { %607 = vmatprep.subr.bf16.mxu0 %v795_v0 }
  0x7c   :  { %608 = vmatpush3.bf16.msra.mxu0 %v651_v44 }
  0x7d   :  { %609 = vmatprep.subr.bf16.mxu0 %v795_v0 }
  0x80   :  { %610 = vmatpush3.bf16.msra.mxu0 %v652_v45 }
  0x81   :  { %611 = vmatprep.subr.bf16.mxu0 %v795_v0 }
  0x84   :  { %612 = vmatpush3.bf16.msra.mxu0 %v653_v46 }
  0x85   :  { %613 = vmatprep.subr.bf16.mxu0 %v795_v0 }
  0x88   :  { %614 = vmatpush3.bf16.msra.mxu0 %v654_v47 }
 0x13e   :  { %v196_v20 = vpop.f32.mrb[0].mxu0 }
 0x13f   :  { %v197_v21 = vadd.f32 %v500_v19, %v196_v20  ;;  %v577_v22 = vpop.f32.mrb[1].mxu0 }
 0x140   :  { %v199_v23 = vpop.f32.mrb[2].mxu0 }
 0x141   :  { %v205_v24 = vmin.f32 %v197_v21, 0.0  ;;  %v200_v25 = vadd.f32 %v500_v19, %v199_v23  ;;  %v578_v26 = vpop.f32.mrb[3].mxu0  ;;  %vm203_vm1 = vcmp.gt.f32.partialorder %v197_v21, 0.0 }
 0x143   :  { %v207_v27 = vmul.f32 1.442695, %v205_v24  ;;  %v206_v28 = vmin.f32 %v200_v25, 0.0  ;;  %vm204_vm2 = vcmp.gt.f32.partialorder %v200_v25, 0.0 }
 0x145   :  { %655 = vpow2.f32 %v207_v27  ;;  %v209_v29 = vmul.f32 1.442695, %v206_v28 }
 0x147   :  { %657 = vpow2.f32 %v209_v29 }
 0x14f   :  { %v656_v30 = vpop.eup %655 }
 0x150   :  { %v510_v31 = vadd.f32 -1.0, %v656_v30 }
 0x151   :  { %v658_v32 = vpop.eup %657 }
 0x152   :  { %v213_v33 = vmul.f32 1.6732632, %v510_v31  ;;  %v511_v34 = vadd.f32 -1.0, %v658_v32 }
 0x154   :  { %v215_v35 = vsel %vm203_vm1, %v197_v21, %v213_v33  ;;  %v214_v36 = vmul.f32 1.6732632, %v511_v34 }
 0x155   :  { %v217_v38 = vmul.f32 1.050701, %v215_v35 }
 0x156   :  { %v216_v37 = vsel %vm204_vm2, %v200_v25, %v214_v36 }
 0x157   :  { %v218_v39 = vmul.f32 1.050701, %v216_v37 }
 0x159   :  { %v219_v40 = vpack.c.bf16 %v218_v39, %v217_v38 }
 0x15b   :  { %596 = vmatmul.mubr.bf16.vlgmr.msra.gmra.mrb[0].mxu1 %v219_v40 }
 0x22e   :  { %v325_v49 = vpop.f32.mrb[0].mxu1 }
 0x22f   :  { %v326_v50 = vadd.f32 %v512_v48, %v325_v49  ;;  %v597_v51 = vpop.f32.mrb[1].mxu1 }
 0x230   :  { %v328_v52 = vpop.f32.mrb[2].mxu1 }
 0x231   :  { %v334_v53 = vmin.f32 %v326_v50, 0.0  ;;  %v329_v54 = vadd.f32 %v512_v48, %v328_v52  ;;  %v598_v55 = vpop.f32.mrb[3].mxu1  ;;  %vm332_vm3 = vcmp.gt.f32.partialorder %v326_v50, 0.0 }
 0x233   :  { %v336_v56 = vmul.f32 1.442695, %v334_v53  ;;  %v335_v57 = vmin.f32 %v329_v54, 0.0  ;;  %vm333_vm4 = vcmp.gt.f32.partialorder %v329_v54, 0.0 }
 0x235   :  { %659 = vpow2.f32 %v336_v56  ;;  %v338_v58 = vmul.f32 1.442695, %v335_v57 }
 0x237   :  { %661 = vpow2.f32 %v338_v58 }
 0x23f   :  { %v660_v59 = vpop.eup %659 }
 0x240   :  { %v521_v60 = vadd.f32 -1.0, %v660_v59 }
 0x241   :  { %v662_v61 = vpop.eup %661 }
 0x242   :  { %v342_v62 = vmul.f32 1.6732632, %v521_v60  ;;  %v522_v63 = vadd.f32 -1.0, %v662_v61 }
 0x244   :  { %v344_v0 = vsel %vm332_vm3, %v326_v50, %v342_v62  ;;  %v343_v1 = vmul.f32 1.6732632, %v522_v63 }
 0x245   :  { %v346_v3 = vmul.f32 1.050701, %v344_v0 }
 0x246   :  { %v345_v2 = vsel %vm333_vm4, %v329_v54, %v343_v1 }
 0x247   :  { %v347_v4 = vmul.f32 1.050701, %v345_v2 }
 0x249   :  { %v348_v5 = vpack.c.bf16 %v347_v4, %v346_v3 }
 0x24b   :  { %616 = vmatmul.mubr.bf16.vlgmr.msra.gmra.mrb[4].mxu0 %v348_v5 }
 0x31e   :  { %v454_v7 = vpop.f32.mrb[4].mxu0 }
 0x31f   :  { %v455_v8 = vadd.f32 %v523_v6, %v454_v7  ;;  %v617_v9 = vpop.f32.mrb[5].mxu0 }
 0x320   :  { %v457_v10 = vpop.f32.mrb[6].mxu0 }
 0x321   :  { %461 = vmax.xlane.f32.xlu0 %v455_v8  ;;  %v618_v11 = vpop.f32.mrb[7].mxu0  ;;  %v458_v12 = vadd.f32 %v523_v6, %v457_v10 }
 0x325   :  { %463 = vmax.xlane.f32.xlu0 %v458_v12 }
 0x3ae   :  { %v462_v13 = vpop.xlane.xlu0 %461 }
 0x3af   :  { %v465_v14 = vsub.f32 %v455_v8, %v462_v13 }
 0x3b1   :  { %v467_v15 = vmul.f32 1.442695, %v465_v14 }
 0x3b2   :  { %v464_v16 = vpop.xlane.xlu0 %463 }
 0x3b3   :  { %663 = vpow2.f32 %v467_v15  ;;  %v466_v17 = vsub.f32 %v458_v12, %v464_v16 }
 0x3b5   :  { %v469_v18 = vmul.f32 1.442695, %v466_v17 }
 0x3b7   :  { %665 = vpow2.f32 %v469_v18 }
 0x3bd   :  { %v664_v19 = vpop.eup %663 }
 0x3be   :  { %471 = vadd.xlane.f32.xlu1 %v664_v19 }
 0x3c1   :  { %v666_v20 = vpop.eup %665 }
 0x3c2   :  { %473 = vadd.xlane.f32.xlu1 %v666_v20 }
 0x44b   :  { %v472_v21 = vpop.xlane.xlu1 %471 }
 0x44c   :  { %667 = vrcp.f32 %v472_v21 }
 0x44f   :  { %v474_v22 = vpop.xlane.xlu1 %473 }
 0x450   :  { %669 = vrcp.f32 %v474_v22 }
 0x456   :  { %v668_v23 = vpop.eup %667 }
 0x457   :  { %v477_v24 = vmul.f32 %v668_v23, %v664_v19 }
 0x459   :  { %479 = vst [vmem:[#allocation10] sm:$0xff] %v477_v24 }
 0x45a   :  { %v670_v25 = vpop.eup %669 }
 0x45b   :  { %v478_v26 = vmul.f32 %v670_v25, %v666_v20 }
 0x45d   :  { %480 = vst [vmem:[#allocation10 + $0x8] sm:$0xff] %v478_v26 }
 0x45e   :  { %770 = shalt.err (!%p767_p8)
}
 0x45f   :  { %s771_s9 = scalar_lea.hbm %s972_s7, 256 }
 0x460   :  { %p772_p9 = scmp.ne.s32.totalorder %s972_s7, %s771_s9  ;;  %p775_p10 = scmp.lt.u32.totalorder %s771_s9, %s972_s7 }
 0x462   :  { %p777_p11 = pnand %p775_p10, %p772_p9 }
 0x464   :  { %780 = shalt.err (!%p777_p11)
}
 0x465   :  { %s798_s16 = smov 128   ;;  %s799_s0 = smov 8  }
 0x466   :  { %492 = dma.vmem_to_hbm [thread:$0]  %s487_s28, 256, %s972_s7, [#allocation4], %s798_s16, %s798_s16, %s799_s0  }
 0x467   :  { %787 = dma.done.wait [#allocation4], 256  }
 0x468   :  { %788 = vsyncadd [#allocation4], 4294967040 }
 0x469   :  { %496 = vsyncpa [#allocation3], 1 }
 0x46a   :  { %497 = vsyncpa [#allocation6], 1 }
 0x46b   :  { %498 = vsyncpa [#allocation9], 1 }
 0x46c   :  { %499 = vsyncpa [#allocation4], 1 }

// kernel: tpu_custom_call.1
= control target key start
LH: loop header
LB: loop body
LE: loop exit
PB: predicated region body
PF: predicated region fallthrough
CT: control target
= control target key end

     0   :  { %12 = vsyncpa [#allocation3], 0  ;;  %s965_s0 = inlined_call_operand.hbm [shape: bf16[16,128], index: 0, kind: input, shape index: {}]   ;;  %s966_s1 = inlined_call_operand.hbm [shape: bf16[128,128], index: 1, kind: input, shape index: {}]   ;;  %s967_s2 = inlined_call_operand.vmem [shape: f32[1,128], index: 2, kind: input, shape index: {}]   ;;  %s968_s3 = inlined_call_operand.hbm [shape: bf16[128,128], index: 3, kind: input, shape index: {}]   ;;  %s969_s4 = inlined_call_operand.vmem [shape: f32[1,128], index: 4, kind: input, shape index: {}]   ;;  %s970_s5 = inlined_call_operand.hbm [shape: bf16[128,128], index: 5, kind: input, shape index: {}]   ;;  %s971_s6 = inlined_call_operand.vmem [shape: f32[1,128], index: 6, kind: input, shape index: {}]   ;;  %s972_s7 = inlined_call_operand.hbm [shape: f32[16,128], index: 7, kind: output, shape index: {}]  }
   0x1   :  { %13 = vsyncpa [#allocation6], 0 }
   0x2   :  { %14 = vsyncpa [#allocation9], 0 }
   0x3   :  { %15 = vsyncpa [#allocation4], 0  ;;  %s789_s24 = smov [#allocation5]   ;;  %s790_s26 = smov [#allocation2]  }
   0x4   :  { %s33_s25 = sshll.u32 %s789_s24, 4  ;;  %s21_s27 = sshll.u32 %s790_s26, 4  ;;  %s34_s25 = int_to_ptr.vmem [resolvable:$true] %s33_s25  ;;  %s840_s27 = int_to_ptr.vmem [resolvable:$true] %s21_s27 }
   0x5   :  { %s671_s30 = scalar_lea.hbm %s966_s1, 1024 }
   0x6   :  { %p672_p0 = scmp.ne.s32.totalorder %s966_s1, %s671_s30  ;;  %p675_p1 = scmp.lt.u32.totalorder %s671_s30, %s966_s1 }
   0x8   :  { %p677_p2 = pnand %p675_p1, %p672_p0 }
   0xa   :  { %680 = shalt.err (!%p677_p2)
}
   0xb   :  { %s681_s12 = scalar_lea.vmem %s34_s25, 1024  ;;  %p686_p4 = scmp.lt.s32.totalorder %s34_s25, %s34_s25 }
   0xc   :  { %p682_p3 = scmp.ne.s32.totalorder %s34_s25, %s681_s12  ;;  %p687_p5 = scmp.lt.s32.totalorder %s681_s12, %s681_s12 }
   0xe   :  { %p688_p6 = por %p687_p5, %p686_p4 }
  0x10   :  { %p689_p7 = pnand %p688_p6, %p682_p3 }
  0x12   :  { %692 = shalt.err (!%p689_p7)
}
  0x13   :  { %s791_s13 = smov 64   ;;  %s792_s14 = smov 4  }
  0x14   :  { %39 = dma.hbm_to_vmem [thread:$0]  %s966_s1, 1024, %s34_s25, [#allocation6], %s791_s13, %s791_s13, %s792_s14  }
  0x15   :  { %s693_s19 = scalar_lea.hbm %s965_s0, 128 }
  0x16   :  { %p694_p8 = scmp.ne.s32.totalorder %s965_s0, %s693_s19  ;;  %p697_p9 = scmp.lt.u32.totalorder %s693_s19, %s965_s0 }
  0x18   :  { %p699_p10 = pnand %p697_p9, %p694_p8 }
  0x1a   :  { %702 = shalt.err (!%p699_p10)
}
  0x1b   :  { %s703_s24 = scalar_lea.vmem %s840_s27, 128  ;;  %p708_p12 = scmp.lt.s32.totalorder %s840_s27, %s840_s27 }
  0x1c   :  { %p704_p11 = scmp.ne.s32.totalorder %s840_s27, %s703_s24  ;;  %p709_p13 = scmp.lt.s32.totalorder %s703_s24, %s703_s24 }
  0x1e   :  { %p710_p0 = por %p709_p13, %p708_p12 }
  0x20   :  { %p711_p1 = pnand %p710_p0, %p704_p11 }
  0x22   :  { %714 = shalt.err (!%p711_p1)
}
  0x23   :  { %27 = dma.hbm_to_vmem [thread:$0]  %s965_s0, 128, %s840_s27, [#allocation3], %s791_s13, %s791_s13, %s792_s14  }
  0x24   :  { %s793_s26 = smov [#allocation7]   ;;  %s794_s29 = smov [#allocation8]  }
  0x25   :  { %s47_s28 = sshll.u32 %s793_s26, 4  ;;  %s61_s30 = sshll.u32 %s794_s29, 4  ;;  %s48_s28 = int_to_ptr.vmem [resolvable:$true] %s47_s28  ;;  %s877_s30 = int_to_ptr.vmem [resolvable:$true] %s61_s30 }
  0x26   :  { %s715_s10 = scalar_lea.hbm %s968_s3, 1024 }
  0x27   :  { %p716_p2 = scmp.ne.s32.totalorder %s968_s3, %s715_s10  ;;  %p719_p3 = scmp.lt.u32.totalorder %s715_s10, %s968_s3 }
  0x29   :  { %p721_p4 = pnand %p719_p3, %p716_p2 }
  0x2b   :  { %724 = shalt.err (!%p721_p4)
}
  0x2c   :  { %s725_s0 = scalar_lea.vmem %s48_s28, 1024  ;;  %p730_p6 = scmp.lt.s32.totalorder %s48_s28, %s48_s28 }
  0x2d   :  { %p726_p5 = scmp.ne.s32.totalorder %s48_s28, %s725_s0  ;;  %p731_p7 = scmp.lt.s32.totalorder %s725_s0, %s725_s0 }
  0x2f   :  { %p732_p8 = por %p731_p7, %p730_p6 }
  0x31   :  { %p733_p9 = pnand %p732_p8, %p726_p5 }
  0x33   :  { %736 = shalt.err (!%p733_p9)
}
  0x34   :  { %53 = dma.hbm_to_vmem [thread:$0]  %s968_s3, 1024, %s48_s28, [#allocation6], %s791_s13, %s791_s13, %s792_s14  }
  0x35   :  { %s737_s20 = scalar_lea.hbm %s970_s5, 1024 }
  0x36   :  { %p738_p10 = scmp.ne.s32.totalorder %s970_s5, %s737_s20  ;;  %p741_p11 = scmp.lt.u32.totalorder %s737_s20, %s970_s5 }
  0x38   :  { %p743_p12 = pnand %p741_p11, %p738_p10 }
  0x3a   :  { %746 = shalt.err (!%p743_p12)
}
  0x3b   :  { %s747_s1 = scalar_lea.vmem %s877_s30, 1024  ;;  %p752_p0 = scmp.lt.s32.totalorder %s877_s30, %s877_s30 }
  0x3c   :  { %p748_p13 = scmp.ne.s32.totalorder %s877_s30, %s747_s1  ;;  %p753_p1 = scmp.lt.s32.totalorder %s747_s1, %s747_s1 }
  0x3e   :  { %p754_p2 = por %p753_p1, %p752_p0 }
  0x40   :  { %p755_p3 = pnand %p754_p2, %p748_p13 }
  0x42   :  { %758 = shalt.err (!%p755_p3)
}
  0x43   :  { %67 = dma.hbm_to_vmem [thread:$0]  %s970_s5, 1024, %s877_s30, [#allocation9], %s791_s13, %s791_s13, %s792_s14  }
  0x44   :  { %781 = dma.done.wait [#allocation3], 128  }
  0x45   :  { %782 = vsyncadd [#allocation3], 4294967168 }
  0x46   :  { %783 = dma.done.wait [#allocation6], 2048  }
  0x47   :  { %784 = vsyncadd [#allocation6], 4294965248 }
  0x48   :  { %785 = dma.done.wait [#allocation9], 1024  }
  0x49   :  { %786 = vsyncadd [#allocation9], 4294966272  ;;  %v795_v0 = vmov 0.0   ;;  %vm796_vm0 = vmmov 0   ;;  %v630_v1 = vld [vmem:[#allocation5] sm:$0xff]   ;;  %v631_v2 = vld [vmem:[#allocation5 + $0x8] sm:$0xff]  }
  0x4a   :  { %559 = vmatprep.subr.bf16.mxu0 %v795_v0  ;;  %575 = vmatprep.mubr.msk.bf16.mxu0 %vm796_vm0, %v795_v0  ;;  %v632_v3 = vld [vmem:[#allocation5 + $0x10] sm:$0xff]   ;;  %v639_v4 = vld [vmem:[#allocation7] sm:$0xff]   ;;  %v633_v5 = vld [vmem:[#allocation5 + $0x18] sm:$0xff]  }
  0x4b   :  { %579 = vmatprep.subr.bf16.mxu1 %v795_v0  ;;  %595 = vmatprep.mubr.msk.bf16.mxu1 %vm796_vm0, %v795_v0  ;;  %v634_v6 = vld [vmem:[#allocation5 + $0x20] sm:$0xff]   ;;  %v635_v7 = vld [vmem:[#allocation5 + $0x28] sm:$0xff]   ;;  %v636_v8 = vld [vmem:[#allocation5 + $0x30] sm:$0xff]  }
  0x4c   :  { %560 = vmatpush3.bf16.msra.mxu0 %v630_v1  ;;  %580 = vmatpush3.bf16.msra.mxu1 %v639_v4  ;;  %v637_v9 = vld [vmem:[#allocation5 + $0x38] sm:$0xff]   ;;  %v640_v11 = vld [vmem:[#allocation7 + $0x8] sm:$0xff]   ;;  %v641_v12 = vld [vmem:[#allocation7 + $0x10] sm:$0xff]  }
  0x4d   :  { %561 = vmatprep.subr.bf16.mxu0 %v795_v0  ;;  %581 = vmatprep.subr.bf16.mxu1 %v795_v0  ;;  %v638_v10 = vld [vmem:[#allocation2] sm:$0xff]   ;;  %v643_v14 = vld [vmem:[#allocation7 + $0x20] sm:$0xff]   ;;  %v644_v15 = vld [vmem:[#allocation7 + $0x28] sm:$0xff]  }
  0x4e   :  { %v642_v13 = vld [vmem:[#allocation7 + $0x18] sm:$0xff]   ;;  %v645_v16 = vld [vmem:[#allocation7 + $0x30] sm:$0xff]   ;;  %v647_v18 = vld [vmem:[#allocation8] sm:$0xff]  }
  0x4f   :  { %v646_v17 = vld [vmem:[#allocation7 + $0x38] sm:$0xff]   ;;  %v648_v41 = vld [vmem:[#allocation8 + $0x8] sm:$0xff]   ;;  %v649_v42 = vld [vmem:[#allocation8 + $0x10] sm:$0xff]  }
  0x50   :  { %562 = vmatpush3.bf16.msra.mxu0 %v631_v2  ;;  %582 = vmatpush3.bf16.msra.mxu1 %v640_v11  ;;  %v500_v19 = vld [vmem:[%s967_s2] ss:$0 sm:$0xff]  ;;  %v651_v44 = vld [vmem:[#allocation8 + $0x20] sm:$0xff]   ;;  %v652_v45 = vld [vmem:[#allocation8 + $0x28] sm:$0xff]  }
  0x51   :  { %563 = vmatprep.subr.bf16.mxu0 %v795_v0  ;;  %583 = vmatprep.subr.bf16.mxu1 %v795_v0  ;;  %v650_v43 = vld [vmem:[#allocation8 + $0x18] sm:$0xff]   ;;  %v653_v46 = vld [vmem:[#allocation8 + $0x30] sm:$0xff]  }
  0x52   :  { %v654_v47 = vld [vmem:[#allocation8 + $0x38] sm:$0xff]  }
  0x53   :  { %v512_v48 = vld [vmem:[%s969_s4] ss:$0 sm:$0xff] }
  0x54   :  { %564 = vmatpush3.bf16.msra.mxu0 %v632_v3  ;;  %584 = vmatpush3.bf16.msra.mxu1 %v641_v12 }
  0x55   :  { %565 = vmatprep.subr.bf16.mxu0 %v795_v0  ;;  %585 = vmatprep.subr.bf16.mxu1 %v795_v0 }
  0x58   :  { %566 = vmatpush3.bf16.msra.mxu0 %v633_v5  ;;  %586 = vmatpush3.bf16.msra.mxu1 %v642_v13 }
  0x59   :  { %567 = vmatprep.subr.bf16.mxu0 %v795_v0  ;;  %587 = vmatprep.subr.bf16.mxu1 %v795_v0 }
  0x5c   :  { %568 = vmatpush3.bf16.msra.mxu0 %v634_v6  ;;  %588 = vmatpush3.bf16.msra.mxu1 %v643_v14  ;;  %v523_v6 = vld [vmem:[%s971_s6] ss:$0 sm:$0xff]  ;;  %s797_s6 = smov [#allocation10]  }
  0x5d   :  { %569 = vmatprep.subr.bf16.mxu0 %v795_v0  ;;  %589 = vmatprep.subr.bf16.mxu1 %v795_v0  ;;  %s486_s28 = sshll.u32 %s797_s6, 4  ;;  %s487_s28 = int_to_ptr.vmem [resolvable:$true] %s486_s28 }
  0x5e   :  { %s759_s29 = scalar_lea.vmem %s487_s28, 256  ;;  %p764_p5 = scmp.lt.s32.totalorder %s487_s28, %s487_s28 }
  0x5f   :  { %p760_p4 = scmp.ne.s32.totalorder %s487_s28, %s759_s29  ;;  %p765_p6 = scmp.lt.s32.totalorder %s759_s29, %s759_s29 }
  0x60   :  { %570 = vmatpush3.bf16.msra.mxu0 %v635_v7  ;;  %590 = vmatpush3.bf16.msra.mxu1 %v644_v15 }
  0x61   :  { %571 = vmatprep.subr.bf16.mxu0 %v795_v0  ;;  %591 = vmatprep.subr.bf16.mxu1 %v795_v0  ;;  %p766_p7 = por %p765_p6, %p764_p5 }
  0x63   :  { %p767_p8 = pnand %p766_p7, %p760_p4 }
  0x64   :  { %572 = vmatpush3.bf16.msra.mxu0 %v636_v8  ;;  %592 = vmatpush3.bf16.msra.mxu1 %v645_v16 }
  0x65   :  { %573 = vmatprep.subr.bf16.mxu0 %v795_v0  ;;  %593 = vmatprep.subr.bf16.mxu1 %v795_v0 }
  0x68   :  { %574 = vmatpush3.bf16.msra.mxu0 %v637_v9  ;;  %594 = vmatpush3.bf16.msra.mxu1 %v646_v17 }
  0x69   :  { %599 = vmatprep.subr.bf16.mxu0 %v795_v0 }
  0x6b   :  { %576 = vmatmul.mubr.bf16.vlgmr.msra.gmra.mrb[0].mxu0 %v638_v10 }
  0x6c   :  { %615 = vmatprep.mubr.msk.bf16.mxu0 %vm796_vm0, %v795_v0  ;;  %600 = vmatpush3.bf16.msra.mxu0 %v647_v18 }
  0x6d   :  { %601 = vmatprep.subr.bf16.mxu0 %v795_v0 }
  0x70   :  { %602 = vmatpush3.bf16.msra.mxu0 %v648_v41 }
  0x71   :  { %603 = vmatprep.subr.bf16.mxu0 %v795_v0 }
  0x74   :  { %604 = vmatpush3.bf16.msra.mxu0 %v649_v42 }
  0x75   :  { %605 = vmatprep.subr.bf16.mxu0 %v795_v0 }
  0x78   :  { %606 = vmatpush3.bf16.msra.mxu0 %v650_v43 }
  0x79   :  { %607 = vmatprep.subr.bf16.mxu0 %v795_v0 }
  0x7c   :  { %608 = vmatpush3.bf16.msra.mxu0 %v651_v44 }
  0x7d   :  { %609 = vmatprep.subr.bf16.mxu0 %v795_v0 }
  0x80   :  { %610 = vmatpush3.bf16.msra.mxu0 %v652_v45 }
  0x81   :  { %611 = vmatprep.subr.bf16.mxu0 %v795_v0 }
  0x84   :  { %612 = vmatpush3.bf16.msra.mxu0 %v653_v46 }
  0x85   :  { %613 = vmatprep.subr.bf16.mxu0 %v795_v0 }
  0x88   :  { %614 = vmatpush3.bf16.msra.mxu0 %v654_v47 }
 0x13e   :  { %v196_v20 = vpop.f32.mrb[0].mxu0 }
 0x13f   :  { %v197_v21 = vadd.f32 %v500_v19, %v196_v20  ;;  %v577_v22 = vpop.f32.mrb[1].mxu0 }
 0x140   :  { %v199_v23 = vpop.f32.mrb[2].mxu0 }
 0x141   :  { %v205_v24 = vmin.f32 %v197_v21, 0.0  ;;  %v200_v25 = vadd.f32 %v500_v19, %v199_v23  ;;  %v578_v26 = vpop.f32.mrb[3].mxu0  ;;  %vm203_vm1 = vcmp.gt.f32.partialorder %v197_v21, 0.0 }
 0x143   :  { %v207_v27 = vmul.f32 1.442695, %v205_v24  ;;  %v206_v28 = vmin.f32 %v200_v25, 0.0  ;;  %vm204_vm2 = vcmp.gt.f32.partialorder %v200_v25, 0.0 }
 0x145   :  { %655 = vpow2.f32 %v207_v27  ;;  %v209_v29 = vmul.f32 1.442695, %v206_v28 }
 0x147   :  { %657 = vpow2.f32 %v209_v29 }
 0x14f   :  { %v656_v30 = vpop.eup %655 }
 0x150   :  { %v510_v31 = vadd.f32 -1.0, %v656_v30 }
 0x151   :  { %v658_v32 = vpop.eup %657 }
 0x152   :  { %v213_v33 = vmul.f32 1.6732632, %v510_v31  ;;  %v511_v34 = vadd.f32 -1.0, %v658_v32 }
 0x154   :  { %v215_v35 = vsel %vm203_vm1, %v197_v21, %v213_v33  ;;  %v214_v36 = vmul.f32 1.6732632, %v511_v34 }
 0x155   :  { %v217_v38 = vmul.f32 1.050701, %v215_v35 }
 0x156   :  { %v216_v37 = vsel %vm204_vm2, %v200_v25, %v214_v36 }
 0x157   :  { %v218_v39 = vmul.f32 1.050701, %v216_v37 }
 0x159   :  { %v219_v40 = vpack.c.bf16 %v218_v39, %v217_v38 }
 0x15b   :  { %596 = vmatmul.mubr.bf16.vlgmr.msra.gmra.mrb[0].mxu1 %v219_v40 }
 0x22e   :  { %v325_v49 = vpop.f32.mrb[0].mxu1 }
 0x22f   :  { %v326_v50 = vadd.f32 %v512_v48, %v325_v49  ;;  %v597_v51 = vpop.f32.mrb[1].mxu1 }
 0x230   :  { %v328_v52 = vpop.f32.mrb[2].mxu1 }
 0x231   :  { %v334_v53 = vmin.f32 %v326_v50, 0.0  ;;  %v329_v54 = vadd.f32 %v512_v48, %v328_v52  ;;  %v598_v55 = vpop.f32.mrb[3].mxu1  ;;  %vm332_vm3 = vcmp.gt.f32.partialorder %v326_v50, 0.0 }
 0x233   :  { %v336_v56 = vmul.f32 1.442695, %v334_v53  ;;  %v335_v57 = vmin.f32 %v329_v54, 0.0  ;;  %vm333_vm4 = vcmp.gt.f32.partialorder %v329_v54, 0.0 }
 0x235   :  { %659 = vpow2.f32 %v336_v56  ;;  %v338_v58 = vmul.f32 1.442695, %v335_v57 }
 0x237   :  { %661 = vpow2.f32 %v338_v58 }
 0x23f   :  { %v660_v59 = vpop.eup %659 }
 0x240   :  { %v521_v60 = vadd.f32 -1.0, %v660_v59 }
 0x241   :  { %v662_v61 = vpop.eup %661 }
 0x242   :  { %v342_v62 = vmul.f32 1.6732632, %v521_v60  ;;  %v522_v63 = vadd.f32 -1.0, %v662_v61 }
 0x244   :  { %v344_v0 = vsel %vm332_vm3, %v326_v50, %v342_v62  ;;  %v343_v1 = vmul.f32 1.6732632, %v522_v63 }
 0x245   :  { %v346_v3 = vmul.f32 1.050701, %v344_v0 }
 0x246   :  { %v345_v2 = vsel %vm333_vm4, %v329_v54, %v343_v1 }
 0x247   :  { %v347_v4 = vmul.f32 1.050701, %v345_v2 }
 0x249   :  { %v348_v5 = vpack.c.bf16 %v347_v4, %v346_v3 }
 0x24b   :  { %616 = vmatmul.mubr.bf16.vlgmr.msra.gmra.mrb[4].mxu0 %v348_v5 }
 0x31e   :  { %v454_v7 = vpop.f32.mrb[4].mxu0 }
 0x31f   :  { %v455_v8 = vadd.f32 %v523_v6, %v454_v7  ;;  %v617_v9 = vpop.f32.mrb[5].mxu0 }
 0x320   :  { %v457_v10 = vpop.f32.mrb[6].mxu0 }
 0x321   :  { %461 = vmax.xlane.f32.xlu0 %v455_v8  ;;  %v618_v11 = vpop.f32.mrb[7].mxu0  ;;  %v458_v12 = vadd.f32 %v523_v6, %v457_v10 }
 0x325   :  { %463 = vmax.xlane.f32.xlu0 %v458_v12 }
 0x3ae   :  { %v462_v13 = vpop.xlane.xlu0 %461 }
 0x3af   :  { %v465_v14 = vsub.f32 %v455_v8, %v462_v13 }
 0x3b1   :  { %v467_v15 = vmul.f32 1.442695, %v465_v14 }
 0x3b2   :  { %v464_v16 = vpop.xlane.xlu0 %463 }
 0x3b3   :  { %663 = vpow2.f32 %v467_v15  ;;  %v466_v17 = vsub.f32 %v458_v12, %v464_v16 }
 0x3b5   :  { %v469_v18 = vmul.f32 1.442695, %v466_v17 }
 0x3b7   :  { %665 = vpow2.f32 %v469_v18 }
 0x3bd   :  { %v664_v19 = vpop.eup %663 }
 0x3be   :  { %471 = vadd.xlane.f32.xlu1 %v664_v19 }
 0x3c1   :  { %v666_v20 = vpop.eup %665 }
 0x3c2   :  { %473 = vadd.xlane.f32.xlu1 %v666_v20 }
 0x44b   :  { %v472_v21 = vpop.xlane.xlu1 %471 }
 0x44c   :  { %667 = vrcp.f32 %v472_v21 }
 0x44f   :  { %v474_v22 = vpop.xlane.xlu1 %473 }
 0x450   :  { %669 = vrcp.f32 %v474_v22 }
 0x456   :  { %v668_v23 = vpop.eup %667 }
 0x457   :  { %v477_v24 = vmul.f32 %v668_v23, %v664_v19 }
 0x459   :  { %479 = vst [vmem:[#allocation10] sm:$0xff] %v477_v24 }
 0x45a   :  { %v670_v25 = vpop.eup %669 }
 0x45b   :  { %v478_v26 = vmul.f32 %v670_v25, %v666_v20 }
 0x45d   :  { %480 = vst [vmem:[#allocation10 + $0x8] sm:$0xff] %v478_v26 }
 0x45e   :  { %770 = shalt.err (!%p767_p8)
}
 0x45f   :  { %s771_s9 = scalar_lea.hbm %s972_s7, 256 }
 0x460   :  { %p772_p9 = scmp.ne.s32.totalorder %s972_s7, %s771_s9  ;;  %p775_p10 = scmp.lt.u32.totalorder %s771_s9, %s972_s7 }
 0x462   :  { %p777_p11 = pnand %p775_p10, %p772_p9 }
 0x464   :  { %780 = shalt.err (!%p777_p11)
}
 0x465   :  { %s798_s16 = smov 128   ;;  %s799_s0 = smov 8  }
 0x466   :  { %492 = dma.vmem_to_hbm [thread:$0]  %s487_s28, 256, %s972_s7, [#allocation4], %s798_s16, %s798_s16, %s799_s0  }
 0x467   :  { %787 = dma.done.wait [#allocation4], 256  }
 0x468   :  { %788 = vsyncadd [#allocation4], 4294967040 }
 0x469   :  { %496 = vsyncpa [#allocation3], 1 }
 0x46a   :  { %497 = vsyncpa [#allocation6], 1 }
 0x46b   :  { %498 = vsyncpa [#allocation9], 1 }
 0x46c   :  { %499 = vsyncpa [#allocation4], 1 }

</bundles_post_ra>
